<compile_context>
chip_gen: v6e
topology: v6e:2x2x1
jax: 0.10.0
libtpu: 0.0.40
codegen_flags: <defaults>
</compile_context>

<pallas_src>
import math

import numpy as np
import jax
import jax.numpy as jnp
from jax.experimental import pallas as pl
from jax.experimental.pallas import tpu as pltpu


# ----------------------------------------------------------------------------
# Static slice construction (direct translation of DebedderNeuron.get_kernel_slices)
# ----------------------------------------------------------------------------
def get_kernel_slices(index_dict):
    slice_lst = []
    for idx, _layer in enumerate(index_dict['layer']):
        kernel_slice_lst = []
        for kernel_dx in range(index_dict['kernel_no'][idx]):
            kernel_start = (index_dict['idx_start'][idx]
                            + kernel_dx * index_dict['kernel_size'][idx]
                            * index_dict['channels_in'][idx])
            kernel_end = (kernel_start
                          + index_dict['kernel_size'][idx] * index_dict['channels_in'][idx])
            bias = (index_dict['idx_start'][idx]
                    + index_dict['kernel_no'][idx] * index_dict['kernel_size'][idx]
                    * index_dict['channels_in'][idx] + kernel_dx)
            index_kernel = list(range(kernel_start, kernel_end))
            index_kernel.append(bias)
            if idx < len(index_dict['layer']) - 1:
                for kernel_dx_next in range(index_dict['kernel_no'][idx + 1]):
                    kernel_next_start = (index_dict['idx_start'][idx + 1]
                                         + kernel_dx * index_dict['kernel_size'][idx + 1]
                                         + kernel_dx_next
                                         * index_dict['channels_in'][idx + 1]
                                         * index_dict['kernel_size'][idx + 1])
                    kernel_next_end = kernel_next_start + index_dict['kernel_size'][idx + 1]
                    index_kernel.extend(list(range(kernel_next_start, kernel_next_end)))
            kernel_slice_lst.append(index_kernel)
        slice_lst.append(kernel_slice_lst)
    return slice_lst


# ----------------------------------------------------------------------------
# One-time parameter packing OUTSIDE the kernel: fold the static scatter-add into
# dense per-token weights, accumulate the bias, and pre-build the 0.5-scale vector.
# ----------------------------------------------------------------------------
def pack_debedder_params(weights, biases, slice_lst, index_dict, d_model, *, tile_n=128):
    i_dim_total = slice_lst[-1][-1][-1] + 1
    i_pad = ((i_dim_total + tile_n - 1) // tile_n) * tile_n

    w_blocks = []
    b_eff = np.zeros((i_pad,), np.float32)
    for idx, kernel_slice_lst in enumerate(slice_lst):
        w = np.asarray(weights[idx], np.float32)       # (i_dim_layer, d_model)
        b = np.asarray(biases[idx], np.float32)        # (i_dim_layer,)
        for kernel_index in kernel_slice_lst:
            ki = np.asarray(kernel_index, np.int64)
            w_t = np.zeros((i_pad, d_model), np.float32)
            np.add.at(w_t, ki, w)                      # static scatter-add of rows
            np.add.at(b_eff, ki, b)
            w_blocks.append(w_t.T)                     # (d_model, i_pad), pre-transposed
    w_eff = np.stack(w_blocks, axis=0)                 # (T, d_model, i_pad)

    scale = np.ones((i_pad,), np.float32)
    if len(index_dict['idx_start']) > 2:
        s = index_dict['idx_start'][1]
        e = index_dict['idx_start'][-1]
        scale[s:e] = 0.5

    return (jnp.asarray(w_eff), jnp.asarray(b_eff)[None, :], jnp.asarray(scale)[None, :],
            i_dim_total, i_pad)


# ----------------------------------------------------------------------------
# Fused kernel: grid = (output-tile [parallel], token [arbitrary, reduction last])
# ----------------------------------------------------------------------------
def _debedder_kernel(x_ref, w_ref, b_ref, scale_ref, y_ref, acc_ref):
    t = pl.program_id(1)

    @pl.when(t == 0)
    def _():
        acc_ref[...] = jnp.zeros_like(acc_ref)

    # x_ref[0]: (batch, d_model)   w_ref[0]: (d_model, tile_n)  -> lane-dense MXU tile
    acc_ref[...] += jnp.dot(x_ref[0], w_ref[0], preferred_element_type=jnp.float32)

    @pl.when(t == pl.num_programs(1) - 1)
    def _():
        y_ref[...] = ((acc_ref[...] + b_ref[...]) * scale_ref[...]).astype(y_ref.dtype)


def debedder_forward(x, w_eff, b_eff, scale, *, tile_n=128):
    """x: (batch, T, d_model) -> y_padded: (batch, I_pad)."""
    bs, n_tok, d_model = x.shape
    t_dim, _, i_pad = w_eff.shape
    assert n_tok == t_dim and i_pad % tile_n == 0

    # Token axis leading so every block's last-two dims equal the full array dims.
    x_t = jnp.transpose(x, (1, 0, 2))                  # (T, batch, d_model)

    return pl.pallas_call(
        _debedder_kernel,
        out_shape=jax.ShapeDtypeStruct((bs, i_pad), x.dtype),
        grid_spec=pltpu.PrefetchScalarGridSpec(
            num_scalar_prefetch=0,
            grid=(i_pad // tile_n, t_dim),
            in_specs=[
                pl.BlockSpec((1, bs, d_model), lambda j, t: (t, 0, 0)),      # x token
                pl.BlockSpec((1, d_model, tile_n), lambda j, t: (t, 0, j)),  # W_eff tile
                pl.BlockSpec((1, tile_n), lambda j, t: (0, j)),              # bias tile
                pl.BlockSpec((1, tile_n), lambda j, t: (0, j)),              # scale tile
            ],
            out_specs=pl.BlockSpec((bs, tile_n), lambda j, t: (0, j)),
            scratch_shapes=[pltpu.VMEM((bs, tile_n), jnp.float32)],
        ),
        compiler_params=pltpu.CompilerParams(
            dimension_semantics=("parallel", "arbitrary"),
            vmem_limit_bytes=16 * 1024 * 1024,   # footprint here is << 1 MiB; explicit anyway
        ),
    )(x_t, w_eff, b_eff, scale)


# ----------------------------------------------------------------------------
# Pure numpy reference (literal translation of DebedderNeuron.forward)
# ----------------------------------------------------------------------------
def reference_forward(x, weights, biases, slice_lst, index_dict):
    x = np.asarray(x, np.float32)
    bs = x.shape[0]
    i_dim_total = slice_lst[-1][-1][-1] + 1
    y = np.zeros((bs, i_dim_total), np.float32)
    embed_dx = 0
    for idx, kernel_slice_lst in enumerate(slice_lst):
        w = np.asarray(weights[idx], np.float32)
        b = np.asarray(biases[idx], np.float32)
        for kernel_index in kernel_slice_lst:
            y_tmp = x[:, embed_dx] @ w.T + b
            y[:, kernel_index] += y_tmp
            embed_dx += 1
    if len(index_dict['idx_start']) > 2:
        s = index_dict['idx_start'][1]
        e = index_dict['idx_start'][-1]
        y[:, s:e] *= 0.5
    return y


# ----------------------------------------------------------------------------
if __name__ == "__main__":
    # Small 3-layer conv-net-style index_dict (3 layers -> exercises the 0.5 branch):
    #   layer0: 4 kernels, 3x3, 2 in-ch   -> weights 0..71,   biases 72..75
    #   layer1: 3 kernels, 3x3, 4 in-ch   -> weights 76..183,  biases 184..186
    #   layer2: 2 kernels, 3x3, 3 in-ch   -> weights 187..240, biases 241..242
    index_dict = {
        'layer': [0, 1, 2],
        'kernel_no': [4, 3, 2],
        'kernel_size': [9, 9, 9],
        'channels_in': [2, 4, 3],
        'idx_start': [0, 76, 187],
    }
    d_model = 32
    batch = 2

    slice_lst = get_kernel_slices(index_dict)
    for kernel_lst in slice_lst:               # mirror the module's layer-wise assert
        i_dim = len(kernel_lst[0])
        for s in kernel_lst:
            assert len(s) == i_dim, "layer-wise slices are not of the same length"

    n_tokens = sum(len(k) for k in slice_lst)  # == len(DebedderNeuron) == 9

    # Deterministic per-layer Linear parameters (torch-Linear-style uniform init).
    key = jax.random.PRNGKey(0)
    keys = jax.random.split(key, 2 * len(slice_lst) + 1)
    bound = 1.0 / math.sqrt(d_model)
    weights, biases = [], []
    for idx, kernel_lst in enumerate(slice_lst):
        i_dim = len(kernel_lst[0])
        weights.append(jax.random.uniform(keys[2 * idx], (i_dim, d_model),
                                          jnp.float32, -bound, bound))
        biases.append(jax.random.uniform(keys[2 * idx + 1], (i_dim,),
                                         jnp.float32, -bound, bound))

    x = jax.random.normal(keys[-1], (batch, n_tokens, d_model), jnp.float32)

    w_eff, b_eff, scale, i_dim_total, i_pad = pack_debedder_params(
        weights, biases, slice_lst, index_dict, d_model, tile_n=128)

    y_pad = debedder_forward(x, w_eff, b_eff, scale, tile_n=128)
    y_pad = jax.block_until_ready(y_pad)
    y = np.asarray(y_pad)[:, :i_dim_total]     # drop the lane padding

    y_ref = reference_forward(x, weights, biases, slice_lst, index_dict)
    assert y.shape == (batch, i_dim_total)
    assert np.allclose(y, y_ref, atol=1e-4, rtol=1e-4), \
        f"max abs err {np.max(np.abs(y - y_ref))}"

    print("KERNEL_OK")
</pallas_src>

<mosaic_0001>
module attributes {stable_mosaic.version = 11 : i64} {
  func.func @_debedder_kernel(%arg0: i32, %arg1: i32, %arg2: memref<1x2x32xf32, #tpu.memory_space<vmem>>, %arg3: memref<1x32x128xf32, #tpu.memory_space<vmem>>, %arg4: memref<1x128xf32, #tpu.memory_space<vmem>>, %arg5: memref<1x128xf32, #tpu.memory_space<vmem>>, %arg6: memref<2x128xf32, #tpu.memory_space<vmem>>, %arg7: memref<2x128xf32, #tpu.memory_space<vmem>>) attributes {dimension_semantics = [#tpu.dimension_semantics<parallel>, #tpu.dimension_semantics<arbitrary>], iteration_bounds = array<i64: 2, 9>, scalar_prefetch = 0 : i64, scratch_operands = 1 : i64, tpu.core_type = #tpu.core_type<tc>, window_params = [{transform_indices = @transform_0, window_bounds = array<i64: 1, 2, 32>}, {transform_indices = @transform_1, window_bounds = array<i64: 1, 32, 128>}, {transform_indices = @transform_2, window_bounds = array<i64: 1, 128>}, {transform_indices = @transform_3, window_bounds = array<i64: 1, 128>}, {transform_indices = @transform_4, window_bounds = array<i64: 2, 128>}]} {
    %c0_i32 = arith.constant 0 : i32
    %0 = arith.cmpi eq, %arg1, %c0_i32 : i32
    %1 = arith.extui %0 : i1 to i32
    %c0_i32_0 = arith.constant 0 : i32
    %2 = arith.cmpi ne, %1, %c0_i32_0 : i32
    scf.if %2 {
      %cst_11 = arith.constant 0.000000e+00 : f32
      %14 = vector.broadcast %cst_11 : f32 to vector<2x128xf32>
      %c0_12 = arith.constant 0 : index
      %c0_13 = arith.constant 0 : index
      %15 = vector.load %arg7[%c0_12, %c0_13] : memref<2x128xf32, #tpu.memory_space<vmem>>, vector<2x128xf32>
      tpu.vector_store %arg7[%c0_12, %c0_13], %14 {strides = array<i32>} : memref<2x128xf32, #tpu.memory_space<vmem>>, vector<2x128xf32>,
    } else {
    }
    %c0 = arith.constant 0 : index
    %c0_1 = arith.constant 0 : index
    %3 = vector.load %arg7[%c0, %c0_1] : memref<2x128xf32, #tpu.memory_space<vmem>>, vector<2x128xf32>
    %c0_2 = arith.constant 0 : index
    %c0_3 = arith.constant 0 : index
    %c0_4 = arith.constant 0 : index
    %4 = vector.load %arg2[%c0_2, %c0_3, %c0_4] : memref<1x2x32xf32, #tpu.memory_space<vmem>>, vector<1x2x32xf32>
    %5 = vector.shape_cast %4 : vector<1x2x32xf32> to vector<2x32xf32>
    %c0_5 = arith.constant 0 : index
    %c0_6 = arith.constant 0 : index
    %c0_7 = arith.constant 0 : index
    %6 = vector.load %arg3[%c0_5, %c0_6, %c0_7] : memref<1x32x128xf32, #tpu.memory_space<vmem>>, vector<1x32x128xf32>
    %7 = vector.shape_cast %6 : vector<1x32x128xf32> to vector<32x128xf32>
    %cst = arith.constant dense<0.000000e+00> : vector<2x128xf32>
    %8 = tpu.matmul %5, %7, %cst {dimension_numbers = #tpu.dot_dimension_numbers<[1], [0], [0], [1], [0, 0, 1, 1], [], []>} : vector<2x32xf32>, vector<32x128xf32>, vector<2x128xf32> -> vector<2x128xf32>
    %9 = arith.addf %3, %8 : vector<2x128xf32>
    %c0_8 = arith.constant 0 : index
    %c0_9 = arith.constant 0 : index
    %10 = vector.load %arg7[%c0_8, %c0_9] : memref<2x128xf32, #tpu.memory_space<vmem>>, vector<2x128xf32>
    tpu.vector_store %arg7[%c0_8, %c0_9], %9 {strides = array<i32>} : memref<2x128xf32, #tpu.memory_space<vmem>>, vector<2x128xf32>,
    %c8_i32 = arith.constant 8 : i32
    %11 = arith.cmpi eq, %arg1, %c8_i32 : i32
    %12 = arith.extui %11 : i1 to i32
    %c0_i32_10 = arith.constant 0 : i32
    %13 = arith.cmpi ne, %12, %c0_i32_10 : i32
    scf.if %13 {
      %c0_11 = arith.constant 0 : index
      %c0_12 = arith.constant 0 : index
      %14 = vector.load %arg7[%c0_11, %c0_12] : memref<2x128xf32, #tpu.memory_space<vmem>>, vector<2x128xf32>
      %c0_13 = arith.constant 0 : index
      %c0_14 = arith.constant 0 : index
      %15 = vector.load %arg4[%c0_13, %c0_14] : memref<1x128xf32, #tpu.memory_space<vmem>>, vector<1x128xf32>
      %16 = vector.broadcast %15 : vector<1x128xf32> to vector<2x128xf32>
      %17 = arith.addf %14, %16 : vector<2x128xf32>
      %c0_15 = arith.constant 0 : index
      %c0_16 = arith.constant 0 : index
      %18 = vector.load %arg5[%c0_15, %c0_16] : memref<1x128xf32, #tpu.memory_space<vmem>>, vector<1x128xf32>
      %19 = vector.broadcast %18 : vector<1x128xf32> to vector<2x128xf32>
      %20 = arith.mulf %17, %19 : vector<2x128xf32>
      %c0_17 = arith.constant 0 : index
      %c0_18 = arith.constant 0 : index
      %21 = vector.load %arg6[%c0_17, %c0_18] : memref<2x128xf32, #tpu.memory_space<vmem>>, vector<2x128xf32>
      tpu.vector_store %arg6[%c0_17, %c0_18], %20 {strides = array<i32>} : memref<2x128xf32, #tpu.memory_space<vmem>>, vector<2x128xf32>,
    } else {
    }
    return
  }
  func.func @transform_0(%arg0: i32, %arg1: i32) -> (i32, i32, i32) {
    %c0_i32 = arith.constant 0 : i32
    %c0_i32_0 = arith.constant 0 : i32
    %c0_i32_1 = arith.constant 0 : i32
    return %arg1, %c0_i32, %c0_i32_0 : i32, i32, i32
  }
  func.func @transform_1(%arg0: i32, %arg1: i32) -> (i32, i32, i32) {
    %c0_i32 = arith.constant 0 : i32
    %c0_i32_0 = arith.constant 0 : i32
    return %arg1, %c0_i32, %arg0 : i32, i32, i32
  }
  func.func @transform_2(%arg0: i32, %arg1: i32) -> (i32, i32) {
    %c0_i32 = arith.constant 0 : i32
    %c0_i32_0 = arith.constant 0 : i32
    return %c0_i32, %arg0 : i32, i32
  }
  func.func @transform_3(%arg0: i32, %arg1: i32) -> (i32, i32) {
    %c0_i32 = arith.constant 0 : i32
    %c0_i32_0 = arith.constant 0 : i32
    return %c0_i32, %arg0 : i32, i32
  }
  func.func @transform_4(%arg0: i32, %arg1: i32) -> (i32, i32) {
    %c0_i32 = arith.constant 0 : i32
    %c0_i32_0 = arith.constant 0 : i32
    return %c0_i32, %arg0 : i32, i32
  }
}

</mosaic_0001>

<bundles_post_ra>
// kernel: tpu_custom_call.1
= control target key start
LH: loop header
LB: loop body
LE: loop exit
PB: predicated region body
PF: predicated region fallthrough
CT: control target
= control target key end

     0   :  { %s1266_s0 = inlined_call_operand.hbm [shape: f32[9,2,32], index: 0, kind: input, shape index: {}]   ;;  %s1267_s1 = inlined_call_operand.hbm [shape: f32[9,32,256], index: 1, kind: input, shape index: {}]   ;;  %s1268_s2 = inlined_call_operand.vmem [shape: f32[1,256], index: 2, kind: input, shape index: {}]   ;;  %s1269_s3 = inlined_call_operand.vmem [shape: f32[1,256], index: 3, kind: input, shape index: {}]   ;;  %s1270_s4 = inlined_call_operand.hbm [shape: f32[2,256], index: 4, kind: output, shape index: {}]  }
   0x1   :  { %1281 = sst [smem:[#allocation22_spill]] %s1266_s0 }
   0x2   :  { %9 = vsyncpa [#allocation4], 0 }
   0x3   :  { %11 = vsyncpa [#allocation4 + $0x1], 0 }
   0x4   :  { %12 = vsyncpa [#allocation7], 0 }
   0x5   :  { %14 = vsyncpa [#allocation7 + $0x1], 0 }
   0x6   :  { %15 = vsyncpa [#allocation5], 0 }
   0x7   :  { %17 = vsyncpa [#allocation5 + $0x1], 0  ;;  %s958_s15 = smov 0   ;;  %s960_s16 = smov 0  }
   0x8   :  { %s962_s17 = smov 0   ;;  %s964_s18 = smov 0  }
   0x9   :  { %s966_s19 = smov 0   ;;  %s968_s20 = smov 0  }
   0xa   :  { %s970_s21 = smov 0   ;;  %s972_s22 = smov 0  }
   0xb   :  { %s974_s23 = smov 0   ;;  %s976_s24 = smov 0  }
   0xc   :  { %s978_s25 = smov 0   ;;  %s980_s26 = smov 0  }
   0xd   :  { %s982_s27 = smov 0   ;;  %s984_s28 = smov 0  }
   0xe LB: > { %1282 = sst [smem:[#allocation12_spill]] %s870_s15  ;;  %s1271_s29 = sadd.s32 4294967295, %s922_s28   ;;  %s922_s28 = sphi %s984_s28, %s23_s28   ;;  %s918_s27 = sphi %s982_s27, %s1330_s27   ;;  %s914_s26 = sphi %s980_s26, %s1329_s26   ;;  %s910_s25 = sphi %s978_s25, %s1328_s25   ;;  %s906_s24 = sphi %s976_s24, %s1327_s24   ;;  %s902_s23 = sphi %s974_s23, %s1315_s23   ;;  %s898_s22 = sphi %s972_s22, %s1326_s22   ;;  %s894_s21 = sphi %s970_s21, %s1325_s21   ;;  %s890_s20 = sphi %s968_s20, %s1324_s20   ;;  %s886_s19 = sphi %s966_s19, %s1323_s19   ;;  %s882_s18 = sphi %s964_s18, %s1322_s18   ;;  %s878_s17 = sphi %s962_s17, %s1312_s17   ;;  %s874_s16 = sphi %s960_s16, %s1321_s16   ;;  %s870_s15 = sphi %s958_s15, %s1320_s15  }
   0xf   : > { %1283 = sst [smem:[#allocation13_spill]] %s878_s17  ;;  %s32_s5 = sadd.s32 1, %s914_s26 }
  0x10   : > { %1284 = sst [smem:[#allocation14_spill]] %s902_s23  ;;  %s35_s6 = sadd.s32 1, %s918_s27 }
  0x11   : > { %1285 = sst [smem:[#allocation15_spill]] %s914_s26  ;;  %p33_p0 = scmp.ge.s32.totalorder %s32_s5, 9 }
  0x12   : > { %s42_s7 = sadd.s32 1, %s902_s23  ;;  %p49_p1 = scmp.ne.s32.totalorder %s902_s23, %s898_s22 }
  0x13   : > { %p50_p2 = scmp.eq.s32.totalorder %s922_s28, 0  ;;  %s1332_s5 = smov (%p33_p0, %s32_s5), 0 }
  0x14   : > { %1286 = sst [smem:[#allocation16_spill]] %s1332_s5  ;;  %s1334_s6 = smov (!%p33_p0, %s35_s6), %s918_s27 }
  0x15   : > { %s39_s8 = ssub.s32 %s914_s26, %s1332_s5  ;;  %p1041_p3 = por %p50_p2, %p49_p1 }
  0x16   : > { %p37_p4 = scmp.ge.s32.totalorder %s1334_s6, 2  ;;  %p40_p5 = scmp.eq.s32.totalorder %s39_s8, 0 }
  0x17   : > { %p55_p6 = scmp.ne.s32.totalorder %s898_s22, %s894_s21  ;;  %p1048_p7 = scmp.eq.s32.totalorder %s1271_s29, 0 }
  0x18   : > { %s1336_s6 = smov (%p37_p4, %s1334_s6), 0  ;;  %s70_s21 = sadd.s32 1, %s890_s20 }
  0x19   : > { %1289 = sst [smem:[#allocation17_spill]] %s1336_s6  ;;  %p1059_p8 = por %p1048_p7, %p55_p6 }
  0x1a   : > { %s1055_s11 = scalar_select %p40_p5, %s902_s23, %s42_s7  }
  0x1b   : > { %s66_s13 = ssub.s32 %s918_s27, %s1336_s6  ;;  %p77_p10 = scmp.ne.s32.totalorder %s890_s20, %s886_s19 }
  0x1c   : > { %1290 = sst [smem:[#allocation18_spill]] %s1055_s11  ;;  %s67_s14 = sor.u32 %s66_s13, %s39_s8 }
  0x1d   : > { %p68_p9 = scmp.eq.s32.totalorder %s67_s14, 0  ;;  %p83_p11 = scmp.ne.s32.totalorder %s886_s19, %s882_s18 }
  0x1e   : > { %p146_p12 = scmp.eq.s32.totalorder %s66_s13, 0  ;;  %p1075_p13 = por %p77_p10, %p50_p2 }
  0x1f   : > { %s1071_s7 = scalar_select %p68_p9, %s890_s20, %s70_s21  }
  0x20   : > { %p1081_p0 = por %p83_p11, %p1048_p7  ;;  %s148_s8 = sadd.s32 1, %s878_s17 }
  0x21   : > { %1292 = sst [smem:[#allocation19_spill]] %s1071_s7  ;;  %p158_p1 = scmp.ne.s32.totalorder %s878_s17, %s874_s16 }
  0x22   : > { %s1294_s29 = scalar_select %p1081_p0, 1, 0 }
  0x23   : > { %s1089_s14 = scalar_select %p146_p12, %s878_s17, %s148_s8  }
  0x24   : > { %s1296_s18 = sadd.s32 4294967295, %s922_s28   ;;  %p164_p5 = scmp.ne.s32.totalorder %s874_s16, %s870_s15 }
  0x25   : > { %1295 = sst [smem:[#allocation20_spill]] %s1089_s14  ;;  %p159_p4 = scmp.eq.s32.totalorder %s1296_s18, 17 }
  0x26   : > { %s1297_s13 = sadd.s32 4294967294, %s922_s28   ;;  %p598_p7 = scmp.lt.s32.totalorder %s922_s28, 18 }
  0x27   : > { %p165_p2 = scmp.eq.s32.totalorder %s1297_s13, 17  ;;  %p1097_p6 = por %p159_p4, %p158_p1 }
  0x28   : > { %s185_s6 = sand.u32 1, %s902_s23   ;;  %s548_s8 = sshll.u32 %s914_s26, 5 }
  0x29   : > { %s1298_s21 = scalar_select %p1097_p6, 1, 0 }
  0x2a   : > { %p1102_p9 = por %p165_p2, %p164_p5  ;;  %s547_s5 = sshll.u32 %s185_s6, 1 }
  0x2b   : > { %s1301_s0 = sld [smem:[#allocation22_spill]]  ;;  %s189_s14 = scalar_lea.vmem [#allocation3], %s547_s5 }
  0x2c   : > { %s1299_s10 = scalar_select %p1102_p9, 1, 0 }
  0x2d   : > { %s196_s17 = sshll.u32 %s189_s14, 4  ;;  %p1113_p10 = pnand %p598_p7, %p1041_p3  ;;  %s197_s17 = int_to_ptr.vmem [resolvable:$true] %s196_s17 }
  0x2e   : > { %1300 = sst [smem:[#allocation21_spill]] %s1299_s10  ;;  %s550_s15 = sshll.u32 %s914_s26, 3 }
  0x2f   : > { %p1120_p11 = pnand %p598_p7, %p1075_p13  ;;  %p552_p12 = scmp.ge.s32.totalorder %s922_s28, 1 }
  0x30   : > { %s186_s23 = scalar_lea.sflag [#allocation4], %s185_s6  ;;  %p720_p1 = pneg %p1113_p10 }
  0x31   : > { %s194_s18 = scalar_lea.hbm %s1301_s0, %s548_s8  ;;  %s731_s11 = scalar_lea.vmem %s197_s17, 32 }
  0x32   : > { %p732_p4 = scmp.ne.s32.totalorder %s197_s17, %s731_s11  ;;  %s924_s5 = smov [#allocation3]  }
  0x33   : > { %s736_s9 = sshll.u32 %s924_s5, 4  ;;  %s737_s9 = int_to_ptr.vmem [resolvable:$false] %s736_s9 }
  0x34   : > { %p734_p5 = pnand %p732_p4, %p720_p1  ;;  %s738_s7 = scalar_lea.vmem %s737_s9, 64 }
  0x35   : > { %p739_p3 = scmp.lt.s32.totalorder %s197_s17, %s737_s9  ;;  %p740_p9 = scmp.lt.s32.totalorder %s738_s7, %s731_s11 }
  0x36   : > { %p735_p2 = pneg %p734_p5 }
  0x37   : > { %p741_p6 = por %p740_p9, %p739_p3 }
  0x39   : > { %p742_p0 = pnand %p741_p6, %p735_p2 }
  0x3b   : > { %745 = shalt.err (!%p742_p0)
}
  0x3c   : > { %590 = dma.hbm_to_vmem [thread:$0]  (!%p1113_p10), %s194_s18, 32, %s197_s17, %s186_s23  }
  0x3d   : > { %p235_p13 = scmp.lt.s32.totalorder %s922_s28, 19  ;;  %s203_s30 = sand.u32 1, %s890_s20  }
  0x3e   : > { %s212_s6 = sadd.s32 %s918_s27, %s550_s15  ;;  %s549_s8 = sshll.u32 %s203_s30, 5 }
  0x3f   : > { %p1134_p7 = pnand %p552_p12, %p235_p13  ;;  %s551_s11 = sshll.u32 %s212_s6, 7 }
  0x40   : > { %s214_s13 = scalar_lea.hbm %s1267_s1, %s551_s11  ;;  %s207_s7 = scalar_lea.vmem [#allocation6], %s549_s8 }
  0x41   : > { %s215_s0 = sshll.u32 %s207_s7, 4  ;;  %s204_s26 = scalar_lea.sflag [#allocation7], %s203_s30  ;;  %s216_s0 = int_to_ptr.vmem [resolvable:$true] %s215_s0 }
  0x42   : > { %p748_p0 = pneg %p1120_p11  ;;  %s759_s17 = scalar_lea.vmem %s216_s0, 512 }
  0x43   : > { %p760_p6 = scmp.ne.s32.totalorder %s216_s0, %s759_s17  ;;  %s925_s15 = smov [#allocation6]  }
  0x44   : > { %s764_s23 = sshll.u32 %s925_s15, 4  ;;  %s765_s23 = int_to_ptr.vmem [resolvable:$false] %s764_s23 }
  0x45   : > { %p762_p9 = pnand %p760_p6, %p748_p0  ;;  %s766_s18 = scalar_lea.vmem %s765_s23, 1024 }
  0x46   : > { %p767_p12 = scmp.lt.s32.totalorder %s216_s0, %s765_s23  ;;  %p768_p1 = scmp.lt.s32.totalorder %s766_s18, %s759_s17 }
  0x47   : > { %p763_p10 = pneg %p762_p9 }
  0x48   : > { %p769_p4 = por %p768_p1, %p767_p12 }
  0x4a   : > { %p770_p5 = pnand %p769_p4, %p763_p10 }
  0x4c   : > { %773 = shalt.err (!%p770_p5)
}
  0x4d   : > { %s926_s6 = smov 256   ;;  %s927_s8 = smov 128  }
  0x4e   : > { %s928_s11 = smov 8   ;;  %239 = sbr.rel (%p1134_p7) target bundleno = 339 (0x153), region = 36 }
  0x4f   : > { %593 = dma.hbm_to_vmem [thread:$0]  (!%p1120_p11), %s214_s13, 512, %s216_s0, %s204_s26, %s926_s6, %s927_s8, %s928_s11  }
  0x50   : > { %s241_s30 = sand.u32 (!%p1134_p7), 1, %s898_s22  }
  0x51   : > { %s1148_s5 = sshll.u32 (!%p1134_p7), %s241_s30, 1  ;;  %s242_s9 = scalar_lea.sflag (!%p1134_p7), [#allocation4], %s241_s30 }
  0x52   : > { %s245_s7 = scalar_lea.vmem (!%p1134_p7), [#allocation3], %s1148_s5 }
  0x53   : > { %857 = dma.done.wait (%p1059_p8), %s242_s9, 32  }
  0x54   : > { %859 = vsyncadd (%p1059_p8), %s242_s9, 4294967264  ;;  %s250_s10 = sand.u32 1, %s886_s19   ;;  %p1305_p11 = scmp.ne.s32.totalorder %s1294_s29, 0 }
  0x55   : > { %s554_s0 = sshll.u32 %s250_s10, 5  ;;  %s251_s26 = scalar_lea.sflag [#allocation7], %s250_s10 }
  0x56   : > { %s254_s14 = scalar_lea.vmem [#allocation6], %s554_s0 }
  0x57   : > { %861 = dma.done.wait (%p1305_p11), %s251_s26, 512  }
  0x58   : > { %863 = vsyncadd (%p1305_p11), %s251_s26, 4294966784  ;;  %s287_s13 = sand.u32 1, %s874_s16   ;;  %p290_p2 = scmp.lt.s32.totalorder %s910_s25, 1 }
  0x59   : > { %s1164_s12 = sshll.u32 %s287_s13, 1  ;;  %p556_p8 = scmp.ne.s32.totalorder %s906_s24, 0 }
  0x5a   : > { %s1167_s17 = scalar_select %p290_p2, %s910_s25, 1 }
  0x5b   : > { %s289_s11 = scalar_lea.vmem [#allocation8], %s1164_s12  ;;  %299 = sbr.rel (%p556_p8) target bundleno = 98 (0x62), region = 48 }
  0x5c   : > { %s292_s18 = scalar_lea.vmem %s1268_s2, %s1167_s17  ;;  %s295_s8 = scalar_lea.vmem %s1269_s3, %s1167_s17 }
  0x60   : > { %v929_v0 = vmov 0.0  }
  0x61   : > { %300 = vst [vmem:[#allocation2] sm:$0x3] %v929_v0 }
  0x62 PF: > { %v306_v1 = vld [vmem:[%s254_s14 + $0x18] sm:$0xff]  ;;  %v930_v2 = vmov 0.0   ;;  %v305_v3 = vld [vmem:[%s254_s14 + $0x10] sm:$0xff]  ;;  %vm931_vm0 = vmmov 0   ;;  %v304_v4 = vld [vmem:[%s254_s14 + $0x8] sm:$0xff]  ;;  %vm307_vm1 = vcmask 261120  }
  0x63   : > { %570 = vmatprep.subr.mxu0 %v930_v2  ;;  %578 = vmatprep.mubr.msk.f32.mxu0 %vm931_vm0, %v930_v2  ;;  %v303_v5 = vld [vmem:[%s254_s14] sm:$0xff]  ;;  %v302_v6 = vld [vmem:[%s245_s7] sm:$0x3]  ;;  %p558_p3 = scmp.ne.s32.totalorder %s906_s24, 8 }
  0x64   : > { %571 = vmatpush3.msra.mxu0 %v306_v1 }
  0x65   : > { %572 = vmatprep.subr.mxu0 %v930_v2 }
  0x66   : > { %573 = vmatpush3.msra.mxu0 %v305_v3 }
  0x67   : > { %574 = vmatprep.subr.mxu0 %v930_v2 }
  0x68   : > { %575 = vmatpush3.msra.mxu0 %v304_v4  ;;  %v301_v7 = vld [vmem:[#allocation2] sm:$0x3] }
  0x69   : > { %576 = vmatprep.subr.mxu0 %v930_v2 }
  0x6a   : > { %577 = vmatpush3.msra.mxu0 %v303_v5 }
  0x6b   : > { %579 = vmatmul.mubr.msk.f32.vlgmr.msra.gmra.mxu0 %vm307_vm1, %v302_v6 }
 0x12a   : > { %386 = sbr.rel (%p558_p3) target bundleno = 315 (0x13b), region = 52 }
 0x12b   : > { %v377_v8 = vpop.f32.mrf.mxu0 }
 0x12c   : > { %v381_v9 = vadd.f32 %v377_v8, %v301_v7 }
 0x12d   : > { %v580_v10 = vpop.f32.mrf.mxu0 }
 0x12e   : > { %382 = vst [vmem:[#allocation2] sm:$0x3] %v381_v9 }
 0x12f   : > { %v559_v12 = vld [vmem:[%s292_s18] ss:$0 sm:$0xff] }
 0x130   : > { %v560_v13 = vld [vmem:[%s295_s8] ss:$0 sm:$0xff] }
 0x135   : > { %v387_v11 = vld [vmem:[#allocation2] sm:$0x3] }
 0x136   : > { %v395_v14 = vadd.f32 %v559_v12, %v387_v11 }
 0x138   : > { %v403_v15 = vmul.f32 %v560_v13, %v395_v14 }
 0x13a   : > { %404 = vst [vmem:[%s289_s11] sm:$0x3] %v403_v15 }
 0x13b PF: > { %s562_s24 = sshll.u32 %s910_s25, 5  ;;  %s419_s14 = sshll.u32 %s289_s11, 4  ;;  %s420_s14 = int_to_ptr.vmem [resolvable:$true] %s419_s14 }
 0x13c   : > { %s417_s26 = scalar_lea.hbm %s1270_s4, %s562_s24  ;;  %s406_s17 = scalar_lea.sflag [#allocation5], %s287_s13 }
 0x13d   : > { %s774_s15 = scalar_lea.vmem %s420_s14, 32  ;;  %p1306_p7 = scmp.ne.s32.totalorder %s1298_s21, 0 }
 0x13e   : > { %p775_p13 = scmp.ne.s32.totalorder %s420_s14, %s774_s15  ;;  %s932_s23 = smov [#allocation8]  }
 0x13f   : > { %s778_s18 = sshll.u32 %s932_s23, 4  ;;  %s779_s18 = int_to_ptr.vmem [resolvable:$false] %s778_s18 }
 0x140   : > { %p776_p0 = pnand %p775_p13, %p1306_p7  ;;  %s780_s29 = scalar_lea.vmem %s779_s18, 64 }
 0x141   : > { %p781_p9 = scmp.lt.s32.totalorder %s420_s14, %s779_s18  ;;  %p782_p10 = scmp.lt.s32.totalorder %s780_s29, %s774_s15 }
 0x142   : > { %p777_p6 = pneg %p776_p0 }
 0x143   : > { %p783_p12 = por %p782_p10, %p781_p9 }
 0x145   : > { %p784_p1 = pnand %p783_p12, %p777_p6 }
 0x147   : > { %787 = shalt.err (!%p784_p1)
}
 0x148   : > { %s788_s25 = scalar_lea.hbm %s417_s26, 32  ;;  %s792_s6 = scalar_lea.hbm %s1270_s4, 64 }
 0x149   : > { %p789_p4 = scmp.ne.s32.totalorder %s417_s26, %s788_s25  ;;  %p793_p2 = scmp.lt.s32.totalorder %s417_s26, %s1270_s4 }
 0x14a   : > { %p794_p8 = scmp.lt.s32.totalorder %s792_s6, %s788_s25 }
 0x14b   : > { %p790_p5 = pnand %p789_p4, %p1306_p7 }
 0x14c   : > { %p795_p3 = por %p794_p8, %p793_p2 }
 0x14d   : > { %p791_p11 = pneg %p790_p5 }
 0x14f   : > { %p796_p13 = pnand %p795_p3, %p791_p11 }
 0x151   : > { %799 = shalt.err (!%p796_p13)
}
 0x152   : > { %585 = dma.vmem_to_hbm [thread:$0]  (%p1306_p7), %s420_s14, 32, %s417_s26, %s406_s17  }
 0x153 PF: > { %s1307_s30 = sld [smem:[#allocation12_spill]]  ;;  %p599_p0 = scmp.ge.s32.totalorder %s922_s28, 2 }
 0x154   : > { %s1308_s9 = sld [smem:[#allocation21_spill]] }
 0x159   : > { %s431_s5 = sand.u32 1, %s1307_s30  }
 0x15a   : > { %p1309_p6 = scmp.ne.s32.totalorder %s1308_s9, 0  ;;  %s432_s7 = scalar_lea.sflag [#allocation5], %s431_s5 }
 0x15c   : > { %p595_p9 = pnand %p599_p0, %p1309_p6 }
 0x15e   : > { %p596_p10 = pneg %p595_p9 }
 0x160   : > { %865 = dma.done.wait (%p596_p10), %s432_s7, 32  }
 0x161   : > { %867 = vsyncadd (%p596_p10), %s432_s7, 4294967264  ;;  %s23_s28 = sadd.s32 1, %s922_s28   ;;  %s1311_s21 = sld [smem:[#allocation13_spill]] }
 0x162   : > { %p1219_p12 = scmp.ge.s32.totalorder %s23_s28, 20   ;;  %s1312_s17 = sld [smem:[#allocation20_spill]] }
 0x163   : > { %s1313_s10 = sld [smem:[#allocation19_spill]]  ;;  %s1320_s15 = smov %s874_s16 }
 0x164   : > { %s1314_s0 = sld [smem:[#allocation14_spill]]  ;;  %s1322_s18 = smov %s886_s19 }
 0x165   : > { %s1315_s23 = sld [smem:[#allocation18_spill]]  ;;  %s1323_s19 = smov %s890_s20 }
 0x166   : > { %s1316_s26 = sld [smem:[#allocation15_spill]]  ;;  %s1328_s25 = smov %s918_s27 }
 0x167   : > { %s1317_s14 = sld [smem:[#allocation16_spill]]  ;;  %s1321_s16 = smov %s1311_s21 }
 0x168   : > { %s1318_s29 = sld [smem:[#allocation17_spill]]  ;;  %s1325_s21 = smov %s898_s22 }
 0x169   : > { %s1324_s20 = smov %s1313_s10 }
 0x16a   : > { %s1326_s22 = smov %s1314_s0  ;;  %22 = sbr.rel (!%p1219_p12) target bundleno = 14 (0xe), region = 108 }
 0x16c   : > { %s1327_s24 = smov %s1316_s26 }
 0x16d   : > { %s1329_s26 = smov %s1317_s14 }
 0x16e   : > { %s1330_s27 = smov %s1318_s29 }
 0x16f   :  { %437 = vsyncpa [#allocation4], 1 }
 0x170   :  { %439 = vsyncpa [#allocation4 + $0x1], 1 }
 0x171   :  { %440 = vsyncpa [#allocation7], 1 }
 0x172   :  { %442 = vsyncpa [#allocation7 + $0x1], 1 }
 0x173   :  { %443 = vsyncpa [#allocation5], 1 }
 0x174   :  { %445 = vsyncpa [#allocation5 + $0x1], 1 }

</bundles_post_ra>
